<compile_context>
chip_gen: v5e
topology: v5e:2x2
jax: 0.10.0
libtpu: 0.0.40
codegen_flags: <defaults>
</compile_context>

<pallas_src>
import functools

import jax
import jax.numpy as jnp
from jax.experimental import pallas as pl
from jax.experimental.pallas import tpu as pltpu

# Sobel taps (same values as the PyTorch module __init__), used by the reference.
_KX = ((-1.0, 0.0, 1.0), (-2.0, 0.0, 2.0), (-1.0, 0.0, 1.0))
_KY = ((1.0, 2.0, 1.0), (0.0, 0.0, 0.0), (-1.0, -2.0, -1.0))


def _sobel_kernel(x_ref, up_ref, dn_ref, o_ref, *, img_h, compute_dtype):
    """x_ref/o_ref: (strip, W) row-strip of the fused (N*H, W) image stack.
    up_ref/dn_ref: tiny row blocks whose last/first row are the strip's
    out-of-block vertical neighbours (halo)."""
    x = x_ref[...].astype(compute_dtype)
    rows, w = x.shape
    halo = up_ref.shape[0]
    s = pl.program_id(0)

    # Row masks from a (rows, 1) iota: ~1/128 the VALU cost of full-tile masks.
    local = jax.lax.broadcasted_iota(jnp.int32, (rows, 1), 0)
    grow = local + s * rows                        # global row in the fused axis
    if (img_h & (img_h - 1)) == 0:                 # power-of-two H -> bit mask
        rin = grow & (img_h - 1)
    else:
        rin = grow % img_h
    at_top = rin == 0                              # first row of an image
    at_bot = rin == img_h - 1                      # last row of an image
    is_first = local == 0                          # first row of this strip
    is_last = local == rows - 1                    # last row of this strip

    # Column masks from a (1, w) iota, broadcast inside the selects.
    col = jax.lax.broadcasted_iota(jnp.int32, (1, w), 1)
    at_left = col == 0
    at_right = col == w - 1

    up_row = up_ref[halo - 1:halo, :].astype(compute_dtype)  # row strip_start-1
    dn_row = dn_ref[0:1, :].astype(compute_dtype)            # row strip_end

    # Vertical neighbours: 2 sublane rolls + halo fix-up + image-boundary mask.
    # (positive shifts only; roll(x, 1)[r] == x[r-1], roll(x, rows-1)[r] == x[r+1])
    x_u = pltpu.roll(x, shift=1, axis=0)
    x_u = jnp.where(is_first, up_row, x_u)         # replace in-block wrap at row 0
    x_u = jnp.where(at_top, 0.0, x_u)              # zero padding above the image
    x_d = pltpu.roll(x, shift=rows - 1, axis=0)
    x_d = jnp.where(is_last, dn_row, x_d)          # replace wrap at last strip row
    x_d = jnp.where(at_bot, 0.0, x_d)              # zero padding below the image

    t = x_u + (x + x) + x_d                        # [1, 2, 1] along H
    v = x_u - x_d                                  # [1, 0,-1] along H

    # Horizontal neighbours: 4 in-vreg lane rolls (XLU slot, off the VALU).
    t_r = jnp.where(at_left, 0.0, pltpu.roll(t, shift=1, axis=1))       # t[:, j-1]
    t_l = jnp.where(at_right, 0.0, pltpu.roll(t, shift=w - 1, axis=1))  # t[:, j+1]
    v_r = jnp.where(at_left, 0.0, pltpu.roll(v, shift=1, axis=1))       # v[:, j-1]
    v_l = jnp.where(at_right, 0.0, pltpu.roll(v, shift=w - 1, axis=1))  # v[:, j+1]

    gx = t_l - t_r                                 # == conv2d(x, Kx, padding=1)
    gy = v_r + (v + v) + v_l                       # == conv2d(x, Ky, padding=1)
    o_ref[...] = (jnp.abs(gx) + jnp.abs(gy)).astype(o_ref.dtype)


def sobelxy(x, *, target_block_bytes=4 << 20, max_block_bytes=6 << 20):
    """Pallas TPU forward of Sobelxy. x: (N, C, H, W), C == 1. Same shape/dtype."""
    n, c, h, w = x.shape
    assert c == 1, "Sobelxy uses a (1,1,3,3) weight -> single input channel"
    t_rows = n * c * h
    xf = x.reshape(t_rows, w)                      # free metadata reshape

    itemsize = x.dtype.itemsize
    sub = {4: 8, 2: 16, 1: 32}.get(itemsize, 8)    # dtype-aware sublane tile

    if t_rows <= sub:
        strip = halo = t_rows                      # single full-extent block
    else:
        halo = sub
        row_bytes = w * itemsize
        r = min(max(1, target_block_bytes // row_bytes),
                max(1, max_block_bytes // row_bytes),
                pl.cdiv(t_rows, 2))                # >=2 steps: megacore + pipelining
        strip = max(sub, (r // sub) * sub)         # sublane-aligned strip height

    rb = strip // halo                             # halo blocks per strip
    n_halo_blocks = pl.cdiv(t_rows, halo)
    grid = (pl.cdiv(t_rows, strip),)               # partial last strip is masked
                                                   # by Pallas on writeback

    compute_dtype = jnp.float32
    if x.dtype == jnp.float32 or x.dtype == jnp.bfloat16:
        compute_dtype = x.dtype                    # bf16-native VPUs on v6e/v7x

    flops = 14 * t_rows * w                        # adds/subs/abs (selects extra)
    bytes_accessed = (2 * t_rows + 2 * halo * grid[0]) * w * itemsize

    out = pl.pallas_call(
        functools.partial(_sobel_kernel, img_h=h, compute_dtype=compute_dtype),
        out_shape=jax.ShapeDtypeStruct((t_rows, w), x.dtype),
        grid=grid,
        in_specs=[
            # The row strip itself.
            pl.BlockSpec((strip, w), lambda s: (s, 0)),
            # Halo just above the strip (its last row == row strip_start - 1);
            # clamped at s == 0 where the value is masked (image top) anyway.
            pl.BlockSpec((halo, w), lambda s: (jnp.maximum(s * rb - 1, 0), 0)),
            # Halo just below the strip (its first row == row strip_end);
            # clamped at the last strip where the value is masked (image bottom).
            pl.BlockSpec((halo, w),
                         lambda s: (jnp.minimum((s + 1) * rb, n_halo_blocks - 1), 0)),
        ],
        out_specs=pl.BlockSpec((strip, w), lambda s: (s, 0)),
        compiler_params=pltpu.CompilerParams(
            dimension_semantics=("parallel",),
            vmem_limit_bytes=48 * 1024 * 1024,
        ),
        cost_estimate=pl.CostEstimate(
            flops=flops, transcendentals=0, bytes_accessed=bytes_accessed),
    )(xf, xf, xf)
    return out.reshape(n, c, h, w)


def _reference(x):
    # Pure-JAX reference: F.conv2d(x, Kx, padding=1) / Ky, abs-sum.
    kx = jnp.array(_KX, jnp.float32)[None, None]   # (1,1,3,3) OIHW
    ky = jnp.array(_KY, jnp.float32)[None, None]
    dn = jax.lax.conv_dimension_numbers(x.shape, kx.shape, ("NCHW", "OIHW", "NCHW"))
    xf = x.astype(jnp.float32)
    cx = jax.lax.conv_general_dilated(xf, kx, (1, 1), ((1, 1), (1, 1)),
                                      dimension_numbers=dn)
    cy = jax.lax.conv_general_dilated(xf, ky, (1, 1), ((1, 1), (1, 1)),
                                      dimension_numbers=dn)
    return (jnp.abs(cx) + jnp.abs(cy)).astype(x.dtype)


if __name__ == "__main__":
    key = jax.random.PRNGKey(0)
    k1, k2 = jax.random.split(key)

    # Case 1: several small images fused along the row axis; strips span whole
    # images, image boundaries fall inside a strip (exercises the rin masks).
    x1 = jax.random.normal(k1, (4, 1, 16, 16), dtype=jnp.float32)
    y1 = jax.jit(sobelxy)(x1)
    jax.block_until_ready(y1)
    assert y1.shape == x1.shape and y1.dtype == x1.dtype
    assert jnp.allclose(y1, _reference(x1), atol=1e-5, rtol=1e-5), \
        "mismatch vs reference conv (case 1)"

    # Case 2: single image, non-pow2 / non-multiple-of-8 H; strips cut through
    # the image interior and the last strip is partial (exercises halo path).
    x2 = jax.random.normal(k2, (1, 1, 40, 128), dtype=jnp.float32)
    y2 = jax.jit(sobelxy)(x2)
    jax.block_until_ready(y2)
    assert y2.shape == x2.shape and y2.dtype == x2.dtype
    assert jnp.allclose(y2, _reference(x2), atol=1e-5, rtol=1e-5), \
        "mismatch vs reference conv (case 2)"

    print("KERNEL_OK")
</pallas_src>

<mosaic_0001>
module attributes {stable_mosaic.version = 11 : i64} {
  func.func @_sobel_kernel(%arg0: i32, %arg1: memref<32x16xf32, #tpu.memory_space<vmem>>, %arg2: memref<8x16xf32, #tpu.memory_space<vmem>>, %arg3: memref<8x16xf32, #tpu.memory_space<vmem>>, %arg4: memref<32x16xf32, #tpu.memory_space<vmem>>) attributes {dimension_semantics = [#tpu.dimension_semantics<parallel>], iteration_bounds = array<i64: 2>, scalar_prefetch = 0 : i64, scratch_operands = 0 : i64, tpu.core_type = #tpu.core_type<tc>, window_params = [{transform_indices = @transform_0, window_bounds = array<i64: 32, 16>}, {transform_indices = @transform_1, window_bounds = array<i64: 8, 16>}, {transform_indices = @transform_2, window_bounds = array<i64: 8, 16>}, {transform_indices = @transform_3, window_bounds = array<i64: 32, 16>}]} {
    %c0 = arith.constant 0 : index
    %c0_0 = arith.constant 0 : index
    %0 = vector.load %arg1[%c0, %c0_0] : memref<32x16xf32, #tpu.memory_space<vmem>>, vector<32x16xf32>
    %1 = tpu.iota {dimensions = array<i32: 0>} : vector<32x1xi32>
    %c32_i32 = arith.constant 32 : i32
    %2 = arith.muli %arg0, %c32_i32 : i32
    %3 = vector.broadcast %2 : i32 to vector<32x1xi32>
    %4 = arith.addi %1, %3 : vector<32x1xi32>
    %c15_i32 = arith.constant 15 : i32
    %5 = vector.broadcast %c15_i32 : i32 to vector<32x1xi32>
    %6 = arith.andi %4, %5 : vector<32x1xi32>
    %c0_i32 = arith.constant 0 : i32
    %7 = vector.broadcast %c0_i32 : i32 to vector<32x1xi32>
    %8 = arith.cmpi eq, %6, %7 : vector<32x1xi32>
    %c15_i32_1 = arith.constant 15 : i32
    %9 = vector.broadcast %c15_i32_1 : i32 to vector<32x1xi32>
    %10 = arith.cmpi eq, %6, %9 : vector<32x1xi32>
    %c0_i32_2 = arith.constant 0 : i32
    %11 = vector.broadcast %c0_i32_2 : i32 to vector<32x1xi32>
    %12 = arith.cmpi eq, %1, %11 : vector<32x1xi32>
    %c31_i32 = arith.constant 31 : i32
    %13 = vector.broadcast %c31_i32 : i32 to vector<32x1xi32>
    %14 = arith.cmpi eq, %1, %13 : vector<32x1xi32>
    %15 = tpu.iota {dimensions = array<i32: 1>} : vector<1x16xi32>
    %c0_i32_3 = arith.constant 0 : i32
    %16 = vector.broadcast %c0_i32_3 : i32 to vector<1x16xi32>
    %17 = arith.cmpi eq, %15, %16 : vector<1x16xi32>
    %c15_i32_4 = arith.constant 15 : i32
    %18 = vector.broadcast %c15_i32_4 : i32 to vector<1x16xi32>
    %19 = arith.cmpi eq, %15, %18 : vector<1x16xi32>
    %c7 = arith.constant 7 : index
    %c0_5 = arith.constant 0 : index
    %20 = vector.load %arg2[%c7, %c0_5] : memref<8x16xf32, #tpu.memory_space<vmem>>, vector<1x16xf32>
    %c0_6 = arith.constant 0 : index
    %c0_7 = arith.constant 0 : index
    %21 = vector.load %arg3[%c0_6, %c0_7] : memref<8x16xf32, #tpu.memory_space<vmem>>, vector<1x16xf32>
    %c1_i32 = arith.constant 1 : i32
    %22 = tpu.dynamic_rotate %0 by %c1_i32 dim 0 : vector<32x16xf32>, i32 -> vector<32x16xf32>
    %23 = vector.shape_cast %12 : vector<32x1xi1> to vector<32x1xi1>
    %24 = vector.broadcast %23 : vector<32x1xi1> to vector<32x16xi1>
    %25 = vector.shape_cast %20 : vector<1x16xf32> to vector<1x16xf32>
    %26 = vector.broadcast %25 : vector<1x16xf32> to vector<32x16xf32>
    %27 = arith.select %24, %26, %22 : vector<32x16xi1>, vector<32x16xf32>
    %cst = arith.constant 0.000000e+00 : f32
    %28 = vector.shape_cast %8 : vector<32x1xi1> to vector<32x1xi1>
    %29 = vector.broadcast %28 : vector<32x1xi1> to vector<32x16xi1>
    %30 = vector.broadcast %cst : f32 to vector<32x16xf32>
    %31 = arith.select %29, %30, %27 : vector<32x16xi1>, vector<32x16xf32>
    %c31_i32_8 = arith.constant 31 : i32
    %32 = tpu.dynamic_rotate %0 by %c31_i32_8 dim 0 : vector<32x16xf32>, i32 -> vector<32x16xf32>
    %33 = vector.shape_cast %14 : vector<32x1xi1> to vector<32x1xi1>
    %34 = vector.broadcast %33 : vector<32x1xi1> to vector<32x16xi1>
    %35 = vector.shape_cast %21 : vector<1x16xf32> to vector<1x16xf32>
    %36 = vector.broadcast %35 : vector<1x16xf32> to vector<32x16xf32>
    %37 = arith.select %34, %36, %32 : vector<32x16xi1>, vector<32x16xf32>
    %cst_9 = arith.constant 0.000000e+00 : f32
    %38 = vector.shape_cast %10 : vector<32x1xi1> to vector<32x1xi1>
    %39 = vector.broadcast %38 : vector<32x1xi1> to vector<32x16xi1>
    %40 = vector.broadcast %cst_9 : f32 to vector<32x16xf32>
    %41 = arith.select %39, %40, %37 : vector<32x16xi1>, vector<32x16xf32>
    %42 = arith.addf %0, %0 : vector<32x16xf32>
    %43 = arith.addf %31, %42 : vector<32x16xf32>
    %44 = arith.addf %43, %41 : vector<32x16xf32>
    %45 = arith.subf %31, %41 : vector<32x16xf32>
    %c1_i32_10 = arith.constant 1 : i32
    %46 = tpu.dynamic_rotate %44 by %c1_i32_10 dim 1 : vector<32x16xf32>, i32 -> vector<32x16xf32>
    %cst_11 = arith.constant 0.000000e+00 : f32
    %47 = vector.shape_cast %17 : vector<1x16xi1> to vector<1x16xi1>
    %48 = vector.broadcast %47 : vector<1x16xi1> to vector<32x16xi1>
    %49 = vector.broadcast %cst_11 : f32 to vector<32x16xf32>
    %50 = arith.select %48, %49, %46 : vector<32x16xi1>, vector<32x16xf32>
    %c15_i32_12 = arith.constant 15 : i32
    %51 = tpu.dynamic_rotate %44 by %c15_i32_12 dim 1 : vector<32x16xf32>, i32 -> vector<32x16xf32>
    %cst_13 = arith.constant 0.000000e+00 : f32
    %52 = vector.shape_cast %19 : vector<1x16xi1> to vector<1x16xi1>
    %53 = vector.broadcast %52 : vector<1x16xi1> to vector<32x16xi1>
    %54 = vector.broadcast %cst_13 : f32 to vector<32x16xf32>
    %55 = arith.select %53, %54, %51 : vector<32x16xi1>, vector<32x16xf32>
    %c1_i32_14 = arith.constant 1 : i32
    %56 = tpu.dynamic_rotate %45 by %c1_i32_14 dim 1 : vector<32x16xf32>, i32 -> vector<32x16xf32>
    %cst_15 = arith.constant 0.000000e+00 : f32
    %57 = vector.shape_cast %17 : vector<1x16xi1> to vector<1x16xi1>
    %58 = vector.broadcast %57 : vector<1x16xi1> to vector<32x16xi1>
    %59 = vector.broadcast %cst_15 : f32 to vector<32x16xf32>
    %60 = arith.select %58, %59, %56 : vector<32x16xi1>, vector<32x16xf32>
    %c15_i32_16 = arith.constant 15 : i32
    %61 = tpu.dynamic_rotate %45 by %c15_i32_16 dim 1 : vector<32x16xf32>, i32 -> vector<32x16xf32>
    %cst_17 = arith.constant 0.000000e+00 : f32
    %62 = vector.shape_cast %19 : vector<1x16xi1> to vector<1x16xi1>
    %63 = vector.broadcast %62 : vector<1x16xi1> to vector<32x16xi1>
    %64 = vector.broadcast %cst_17 : f32 to vector<32x16xf32>
    %65 = arith.select %63, %64, %61 : vector<32x16xi1>, vector<32x16xf32>
    %66 = arith.subf %55, %50 : vector<32x16xf32>
    %67 = arith.addf %45, %45 : vector<32x16xf32>
    %68 = arith.addf %60, %67 : vector<32x16xf32>
    %69 = arith.addf %68, %65 : vector<32x16xf32>
    %70 = math.absf %66 : vector<32x16xf32>
    %71 = math.absf %69 : vector<32x16xf32>
    %72 = arith.addf %70, %71 : vector<32x16xf32>
    %c0_18 = arith.constant 0 : index
    %c0_19 = arith.constant 0 : index
    %73 = vector.load %arg4[%c0_18, %c0_19] : memref<32x16xf32, #tpu.memory_space<vmem>>, vector<32x16xf32>
    tpu.vector_store %arg4[%c0_18, %c0_19], %72 {strides = array<i32>} : memref<32x16xf32, #tpu.memory_space<vmem>>, vector<32x16xf32>,
    return
  }
  func.func @transform_0(%arg0: i32) -> (i32, i32) {
    %c0_i32 = arith.constant 0 : i32
    %c0_i32_0 = arith.constant 0 : i32
    return %arg0, %c0_i32 : i32, i32
  }
  func.func @transform_1(%arg0: i32) -> (i32, i32) {
    %c4_i32 = arith.constant 4 : i32
    %0 = arith.muli %arg0, %c4_i32 : i32
    %c1_i32 = arith.constant 1 : i32
    %1 = arith.subi %0, %c1_i32 : i32
    %c0_i32 = arith.constant 0 : i32
    %2 = arith.maxsi %1, %c0_i32 : i32
    %c0_i32_0 = arith.constant 0 : i32
    %c0_i32_1 = arith.constant 0 : i32
    return %2, %c0_i32_0 : i32, i32
  }
  func.func @transform_2(%arg0: i32) -> (i32, i32) {
    %c1_i32 = arith.constant 1 : i32
    %0 = arith.addi %arg0, %c1_i32 : i32
    %c4_i32 = arith.constant 4 : i32
    %1 = arith.muli %0, %c4_i32 : i32
    %c7_i32 = arith.constant 7 : i32
    %2 = arith.minsi %1, %c7_i32 : i32
    %c0_i32 = arith.constant 0 : i32
    %c0_i32_0 = arith.constant 0 : i32
    return %2, %c0_i32 : i32, i32
  }
  func.func @transform_3(%arg0: i32) -> (i32, i32) {
    %c0_i32 = arith.constant 0 : i32
    %c0_i32_0 = arith.constant 0 : i32
    return %arg0, %c0_i32 : i32, i32
  }
}

</mosaic_0001>

<bundles_post_ra>
// kernel: sobelxy.1
= control target key start
LH: loop header
LB: loop body
LE: loop exit
PB: predicated region body
PF: predicated region fallthrough
CT: control target
= control target key end

     0   :  { %s1542_s0 = inlined_call_operand.hbm [shape: f32[64,16], index: 0, kind: input, shape index: {}, may-alias: {0,1,2}]   ;;  %s1543_s1 = inlined_call_operand.hbm [shape: f32[64,16], index: 1, kind: input, shape index: {}, may-alias: {0,1,2}]   ;;  %s1544_s2 = inlined_call_operand.hbm [shape: f32[64,16], index: 2, kind: input, shape index: {}, may-alias: {0,1,2}]   ;;  %s1545_s3 = inlined_call_operand.hbm [shape: f32[64,16], index: 3, kind: output, shape index: {}]  }
   0x1   :  { %1556 = sst [smem:[#allocation19_spill]] %s1543_s1 }
   0x2   :  { %1557 = sst [smem:[#allocation20_spill]] %s1545_s3 }
   0x3   :  { %8 = vsyncpa [#allocation3], 0 }
   0x4   :  { %10 = vsyncpa [#allocation3 + $0x1], 0 }
   0x5   :  { %11 = vsyncpa [#allocation6], 0 }
   0x6   :  { %13 = vsyncpa [#allocation6 + $0x1], 0 }
   0x7   :  { %14 = vsyncpa [#allocation4], 0 }
   0x8   :  { %16 = vsyncpa [#allocation4 + $0x1], 0  ;;  %s1111_s12 = smov 0   ;;  %s1113_s13 = smov 0  }
   0x9   :  { %s1115_s14 = smov 0   ;;  %s1117_s15 = smov 0  }
   0xa   :  { %s1119_s16 = smov 0   ;;  %s1121_s17 = smov 0  }
   0xb   :  { %s1123_s18 = smov 0   ;;  %s1125_s19 = smov 0  }
   0xc   :  { %s1127_s20 = smov 0   ;;  %s1129_s21 = smov 0  }
   0xd LB: > { %1558 = sst [smem:[#allocation13_spill]] %s1066_s17  ;;  %s1160_s22 = sadd.s32 4294967295, %s1082_s21   ;;  %s1082_s21 = sphi %s1129_s21, %s1588_s21   ;;  %s1078_s20 = sphi %s1127_s20, %s1592_s20   ;;  %s1074_s19 = sphi %s1125_s19, %s1600_s19   ;;  %s1070_s18 = sphi %s1123_s18, %s1599_s18   ;;  %s1066_s17 = sphi %s1121_s17, %s1598_s17   ;;  %s1062_s16 = sphi %s1119_s16, %s1597_s16   ;;  %s1058_s15 = sphi %s1117_s15, %s1596_s15   ;;  %s1054_s14 = sphi %s1115_s14, %s1595_s14   ;;  %s1050_s13 = sphi %s1113_s13, %s1594_s13   ;;  %s1046_s12 = sphi %s1111_s12, %s1593_s12  }
   0xe   : > { %1559 = sst [smem:[#allocation14_spill]] %s1078_s20  ;;  %p1555_p0 = scmp.eq.s32.totalorder %s1082_s21, 0 }
   0xf   : > { %p1548_p1 = scmp.eq.s32.totalorder %s1160_s22, 0  ;;  %s716_s23 = sshll.u32 %s1082_s21, 2 }
  0x10   : > { %s717_s24 = sadd.s32 4294967295, %s716_s23  ;;  %s1165_s25 = sadd.s32 4, %s716_s23 }
  0x11   : > { %p54_p2 = scmp.gt.s32.totalorder %s717_s24, 0  ;;  %s719_s26 = sadd.s32 4294967295, %s1165_s25 }
  0x12   : > { %p58_p3 = scmp.gt.s32.totalorder %s719_s26, 0  ;;  %s63_s27 = sadd.s32 1, %s1066_s17 }
  0x13   : > { %s1602_s24 = smov (!%p54_p2, %s717_s24), 0  ;;  %p70_p4 = scmp.ne.s32.totalorder %s1066_s17, %s1062_s16 }
  0x14   : > { %s1604_s26 = smov (!%p58_p3, %s719_s26), 0  ;;  %p76_p5 = scmp.ne.s32.totalorder %s1062_s16, %s1058_s15 }
  0x15   : > { %s60_s28 = ssub.s32 %s1602_s24, %s1604_s26  ;;  %s1549_s29 = sadd.s32 4, %s1165_s25 }
  0x16   : > { %p61_p6 = scmp.eq.s32.totalorder %s60_s28, 0  ;;  %p1175_p7 = por %p70_p4, %p1555_p0 }
  0x17   : > { %p1181_p8 = por %p76_p5, %p1548_p1  ;;  %p1187_p9 = scmp.lt.s32.totalorder %s1549_s29, 7 }
  0x18   : > { %s1192_s6 = scalar_select %p61_p6, %s1066_s17, %s63_s27  }
  0x19   : > { %p1547_p11 = scmp.lt.s32.totalorder %s1082_s21, 2  ;;  %s182_s7 = sand.u32 1, %s1082_s21  }
  0x1a   : > { %1563 = sst [smem:[#allocation15_spill]] %s1192_s6  ;;  %s184_s8 = sand.u32 1, %s1066_s17  }
  0x1b   : > { %s727_s9 = sshll.u32 %s184_s8, 3  ;;  %s730_s10 = sshll.u32 %s1602_s24, 3 }
  0x1c   : > { %s1564_s1 = sld [smem:[#allocation19_spill]]  ;;  %s186_s26 = scalar_lea.vmem [#allocation5], %s727_s9 }
  0x1d   : > { %s198_s28 = sshll.u32 %s186_s26, 4  ;;  %p1205_p12 = pnand %p1547_p11, %p1175_p7  ;;  %s199_s28 = int_to_ptr.vmem [resolvable:$true] %s198_s28 }
  0x1e   : > { %p734_p13 = scmp.ge.s32.totalorder %s1082_s21, 1  ;;  %p226_p2 = scmp.lt.s32.totalorder %s1082_s21, 3 }
  0x1f   : > { %s1211_s8 = scalar_lea.sflag [#allocation6], %s182_s7  ;;  %p874_p4 = pneg %p1205_p12 }
  0x22   : > { %s194_s23 = scalar_lea.hbm %s1564_s1, %s730_s10  ;;  %s877_s10 = scalar_lea.hbm %s1564_s1, 64 }
  0x23   : > { %s196_s3 = sshll.u32 %s194_s23, 4  ;;  %s197_s3 = int_to_ptr.hbm [resolvable:$true] %s196_s3 }
  0x24   : > { %s870_s24 = sshra.s32 %s197_s3, 4  ;;  %s871_s24 = int_to_ptr.hbm [resolvable:$true] %s870_s24 }
  0x25   : > { %s872_s11 = scalar_lea.hbm %s871_s24, 8  ;;  %p878_p7 = scmp.lt.s32.totalorder %s871_s24, %s1564_s1 }
  0x26   : > { %p873_p3 = scmp.ne.s32.totalorder %s871_s24, %s872_s11  ;;  %p879_p10 = scmp.lt.s32.totalorder %s877_s10, %s872_s11 }
  0x28   : > { %p875_p5 = pnand %p874_p4, %p873_p3  ;;  %p880_p11 = por %p879_p10, %p878_p7 }
  0x2a   : > { %p876_p6 = pneg %p875_p5 }
  0x2c   : > { %p881_p1 = pnand %p880_p11, %p876_p6 }
  0x2e   : > { %884 = shalt.err (!%p881_p1)
}
  0x2f   : > { %771 = dma.hbm_to_vmem [thread:$0]  (!%p1205_p12), %s197_s3, 128, %s199_s28, %s1211_s8  }
  0x30   : > { %p1228_p1 = pnand %p734_p13, %p226_p2  ;;  %s715_s26 = sadd.s32 4294967294, %s1082_s21  }
  0x31   : > { %s1234_s27 = sadd.s32 1, %s1082_s21   ;;  %s29_s11 = sadd.s32 1, %s1078_s20 }
  0x32   : > { %1567 = sst [smem:[#allocation16_spill]] %s1234_s27  ;;  %s26_s24 = ssub.s32 %s1082_s21, %s1234_s27 }
  0x33   : > { %p27_p10 = scmp.eq.s32.totalorder %s26_s24, 0  ;;  %p36_p11 = scmp.ne.s32.totalorder %s1078_s20, %s1074_s19 }
  0x34   : > { %p42_p3 = scmp.ne.s32.totalorder %s1074_s19, %s1070_s18  ;;  %p134_p4 = scmp.eq.s32.totalorder %s1160_s22, 1 }
  0x35   : > { %s1245_s9 = scalar_select %p27_p10, %s1078_s20, %s29_s11  }
  0x36   : > { %p1249_p12 = por %p1555_p0, %p36_p11  ;;  %p1570_p13 = scmp.eq.s32.totalorder %s1160_s22, 0 }
  0x37   : > { %1568 = sst [smem:[#allocation17_spill]] %s1245_s9  ;;  %p1259_p5 = por %p134_p4, %p36_p11 }
  0x38   : > { %p1255_p2 = por %p1570_p13, %p42_p3  ;;  %p140_p6 = scmp.eq.s32.totalorder %s715_s26, 1 }
  0x39   : > { %s160_s10 = sand.u32 1, %s1078_s20   ;;  %s751_s15 = sshll.u32 %s1082_s21, 5 }
  0x3a   : > { %p1265_p7 = por %p140_p6, %p42_p3  ;;  %s724_s24 = sshll.u32 %s160_s10, 5 }
  0x3b   : > { %s169_s1 = scalar_lea.hbm %s1542_s0, %s751_s15  ;;  %s164_s6 = scalar_lea.vmem [#allocation2], %s724_s24 }
  0x3c   : > { %s1573_s23 = scalar_select %p1265_p7, 1, 0 }
  0x3d   : > { %s170_s9 = sshll.u32 %s169_s1, 4  ;;  %s172_s17 = sshll.u32 %s164_s6, 4  ;;  %s171_s9 = int_to_ptr.hbm [resolvable:$true] %s170_s9  ;;  %s173_s17 = int_to_ptr.vmem [resolvable:$true] %s172_s17 }
  0x3e   : > { %1574 = sst [smem:[#allocation18_spill]] %s1573_s23  ;;  %p1575_p10 = scmp.lt.s32.totalorder %s1082_s21, 2 }
  0x3f   : > { %s161_s20 = scalar_lea.sflag [#allocation3], %s160_s10  ;;  %s900_s27 = sshra.s32 %s171_s9, 4  ;;  %s901_s27 = int_to_ptr.hbm [resolvable:$true] %s900_s27 }
  0x40   : > { %p1276_p11 = pnand %p1575_p10, %p1249_p12  ;;  %s902_s23 = scalar_lea.hbm %s901_s27, 32 }
  0x41   : > { %p903_p3 = scmp.ne.s32.totalorder %s901_s27, %s902_s23  ;;  %s907_s6 = scalar_lea.hbm %s1542_s0, 64 }
  0x42   : > { %p904_p4 = pneg %p1276_p11  ;;  %p908_p12 = scmp.lt.s32.totalorder %s901_s27, %s1542_s0 }
  0x43   : > { %p909_p10 = scmp.lt.s32.totalorder %s907_s6, %s902_s23 }
  0x44   : > { %p905_p13 = pnand %p904_p4, %p903_p3 }
  0x45   : > { %p910_p0 = por %p909_p10, %p908_p12 }
  0x46   : > { %p906_p6 = pneg %p905_p13 }
  0x48   : > { %p911_p7 = pnand %p910_p0, %p906_p6 }
  0x4a   : > { %914 = shalt.err (!%p911_p7)
}
  0x4b   : > { %s1084_s10 = smov 128   ;;  %s1085_s27 = smov 8  }
  0x4c   : > { %768 = dma.hbm_to_vmem [thread:$0]  (!%p1276_p11), %s171_s9, 512, %s173_s17, %s161_s20, %s1084_s10, %s1084_s10, %s1085_s27  }
  0x4d   : > { %p88_p0 = scmp.lt.s32.totalorder %s1165_s25, 7  ;;  %s1577_s23 = sadd.s32 4, %s1165_s25 }
  0x4e   : > { %s1606_s23 = smov (!%p1187_p9, %s1577_s23), 7  ;;  %s97_s24 = sadd.s32 1, %s1054_s14 }
  0x4f   : > { %s1608_s25 = smov (!%p88_p0, %s1165_s25), 7  ;;  %p104_p7 = scmp.ne.s32.totalorder %s1054_s14, %s1050_s13 }
  0x50   : > { %s94_s11 = ssub.s32 %s1608_s25, %s1606_s23  ;;  %p110_p3 = scmp.ne.s32.totalorder %s1050_s13, %s1046_s12 }
  0x51   : > { %p95_p4 = scmp.eq.s32.totalorder %s94_s11, 0  ;;  %p1578_p13 = scmp.eq.s32.totalorder %s1082_s21, 0 }
  0x52   : > { %p1579_p12 = scmp.eq.s32.totalorder %s1160_s22, 0  ;;  %s207_s26 = sand.u32 1, %s1054_s14  }
  0x53   : > { %p106_p6 = por %p104_p7, %p1578_p13  ;;  %s731_s20 = sshll.u32 %s207_s26, 3 }
  0x54   : > { %p1305_p10 = por %p110_p3, %p1579_p12  ;;  %s733_s5 = sshll.u32 %s1608_s25, 3 }
  0x55   : > { %s1311_s17 = scalar_select %p95_p4, %s1054_s14, %s97_s24  }
  0x56   : > { %s217_s6 = scalar_lea.hbm %s1544_s2, %s733_s5  ;;  %s209_s15 = scalar_lea.vmem [#allocation7], %s731_s20 }
  0x57   : > { %s219_s3 = sshll.u32 %s217_s6, 4  ;;  %s221_s12 = sshll.u32 %s209_s15, 4  ;;  %s220_s3 = int_to_ptr.hbm [resolvable:$true] %s219_s3  ;;  %s222_s12 = int_to_ptr.vmem [resolvable:$true] %s221_s12 }
  0x58   : > { %p1581_p9 = scmp.lt.s32.totalorder %s1082_s21, 2  ;;  %s930_s27 = sshra.s32 %s220_s3, 4  ;;  %s931_s27 = int_to_ptr.hbm [resolvable:$true] %s930_s27 }
  0x59   : > { %s932_s23 = scalar_lea.hbm %s931_s27, 8  ;;  %s937_s11 = scalar_lea.hbm %s1544_s2, 64 }
  0x5a   : > { %p1318_p11 = pnand %p1581_p9, %p106_p6  ;;  %p933_p0 = scmp.ne.s32.totalorder %s931_s27, %s932_s23 }
  0x5b   : > { %p938_p13 = scmp.lt.s32.totalorder %s931_s27, %s1544_s2  ;;  %p939_p6 = scmp.lt.s32.totalorder %s937_s11, %s932_s23 }
  0x5c   : > { %p934_p7 = pneg %p1318_p11 }
  0x5d   : > { %p940_p12 = por %p939_p6, %p938_p13 }
  0x5e   : > { %p935_p3 = pnand %p934_p7, %p933_p0 }
  0x60   : > { %p936_p4 = pneg %p935_p3 }
  0x62   : > { %p941_p9 = pnand %p940_p12, %p936_p4 }
  0x64   : > { %944 = shalt.err (!%p941_p9)
}
  0x65   : > { %774 = dma.hbm_to_vmem [thread:$0]  (!%p1318_p11), %s220_s3, 128, %s222_s12, %s1211_s8  }
  0x66   : > { %230 = sbr.rel (%p1228_p1) target bundleno = 520 (0x208), region = 32  ;;  %s1336_s5 = sand.u32 (!%p1228_p1), 1, %s1074_s19  }
  0x67   : > { %s735_s9 = sshll.u32 (!%p1228_p1), %s1336_s5, 5  ;;  %s233_s29 = scalar_lea.sflag (!%p1228_p1), [#allocation3], %s1336_s5 }
  0x68   : > { %s1342_s6 = scalar_lea.vmem (!%p1228_p1), [#allocation2], %s735_s9 }
  0x6b   : > { %1029 = dma.done.wait (%p1255_p2), %s233_s29, 512  }
  0x6c   : > { %1031 = vsyncadd (%p1255_p2), %s233_s29, 4294966784  ;;  %s242_s8 = sand.u32 1, %s1160_s22   ;;  %s244_s7 = sand.u32 1, %s1062_s16  }
  0x6d   : > { %s1350_s3 = sshll.u32 %s244_s7, 3  ;;  %s243_s15 = scalar_lea.sflag [#allocation6], %s242_s8 }
  0x6e   : > { %s246_s12 = scalar_lea.vmem [#allocation5], %s1350_s3 }
  0x6f   : > { %1033 = dma.done.wait (%p1181_p8), %s243_s15, 128  }
  0x70   : > { %1035 = vsyncadd (%p1181_p8), %s243_s15, 4294967168  ;;  %s254_s10 = sand.u32 1, %s1050_s13  }
  0x71   : > { %s1358_s28 = sshll.u32 %s254_s10, 3 }
  0x72   : > { %s256_s27 = scalar_lea.vmem [#allocation7], %s1358_s28 }
  0x73   : > { %1037 = dma.done.wait (%p1305_p10), %s243_s15, 128  }
  0x74   : > { %1039 = vsyncadd (%p1305_p10), %s243_s15, 4294967168  ;;  %v304_v0 = vlaneseq  ;;  %s739_s4 = sshll.u32 %s1160_s22, 5  ;;  %v301_v9 = vld [vmem:[%s1342_s6 + $0x8] sm:$0xff]  ;;  %v302_v10 = vld [vmem:[%s1342_s6 + $0x10] sm:$0xff]  ;;  %s1086_s1 = smov 16   ;;  %vm425_vm12 = vcmask 1047680  }
  0x75   : > { %v310_v2 = vstv %s739_s4  ;;  %v303_v11 = vld [vmem:[%s1342_s6 + $0x18] sm:$0xff]  ;;  %v342_v15 = vrot.slane %v301_v9, 7  ;;  %v343_v16 = vrot.slane %v302_v10, 7  ;;  %v377_v17 = vrot.slane %v302_v10, 1  ;;  %v300_v18 = vld [vmem:[%s1342_s6] sm:$0xff]  ;;  %s1087_s23 = smov 113  }
  0x76   : > { %v305_v1 = vshrl.u32 %v304_v0, 7  ;;  %v378_v19 = vrot.slane %v303_v11, 1  ;;  %v341_v21 = vrot.slane %v300_v18, 7  ;;  %v376_v22 = vrot.slane %v301_v9, 1  ;;  %v868_v33 = vld [vmem:[%s256_s27] ss:$0 sm:$0xff] }
  0x77   : > { %v869_v34 = vld [vmem:[%s246_s12 + $0x7] ss:$0 sm:$0xff]  ;;  %v344_v36 = vrot.slane %v303_v11, 7  ;;  %v375_v37 = vrot.slane %v300_v18, 1  ;;  %v409_v38 = vadd.f32 %v300_v18, %v300_v18  ;;  %v412_v50 = vadd.f32 %v303_v11, %v303_v11  ;;  %s1088_s25 = smov 127   ;;  %s1471_s24 = scalar_lea.vmem [#allocation8], %s735_s9 }
  0x78   : > { %v307_v3 = vadd.s32 16, %v305_v1  ;;  %v306_v4 = vadd.s32 8, %v305_v1  ;;  %v308_v5 = vadd.s32 24, %v305_v1  ;;  %v311_v6 = vadd.s32 %v310_v2, %v305_v1  ;;  %s1583_s20 = sld [smem:[#allocation20_spill]]  ;;  %s596_s22 = sshll.u32 %s1471_s24, 4  ;;  %s597_s22 = int_to_ptr.vmem [resolvable:$true] %s596_s22 }
  0x79   : > { %vm345_vm0 = vcmp.lt.s32.totalorder %v305_v1, 1  ;;  %vm379_vm1 = vcmp.lt.s32.totalorder %v305_v1, 7  ;;  %vm327_vm2 = vcmp.eq.s32.totalorder %v305_v1, 0  ;;  %v410_v52 = vadd.f32 %v301_v9, %v301_v9  ;;  %s584_s8 = scalar_lea.sflag [#allocation4], %s1336_s5 }
  0x7a   : > { %v313_v7 = vadd.s32 %v310_v2, %v307_v3  ;;  %v312_v8 = vadd.s32 %v310_v2, %v306_v4  ;;  %v314_v12 = vadd.s32 %v310_v2, %v308_v5  ;;  %v315_v13 = vand.u32 15, %v311_v6 }
  0x7b   : > { %v347_v23 = vsel %vm345_vm0, %v342_v15, %v343_v16  ;;  %v380_v26 = vsel %vm379_vm1, %v377_v17, %v378_v19  ;;  %v348_v28 = vsel %vm345_vm0, %v341_v21, %v342_v15  ;;  %v381_v29 = vsel %vm379_vm1, %v376_v22, %v377_v17 }
  0x7c   : > { %v317_v14 = vand.u32 15, %v313_v7  ;;  %v316_v20 = vand.u32 15, %v312_v8  ;;  %v318_v24 = vand.u32 15, %v314_v12  ;;  %vm334_vm7 = vcmp.eq.s32.totalorder %v308_v5, 31 }
  0x7d   : > { %vm319_vm10 = vcmp.eq.s32.totalorder %v315_v13, 0  ;;  %vm323_vm11 = vcmp.eq.s32.totalorder %v315_v13, 15  ;;  %v346_v39 = vsel %vm345_vm0, %v343_v16, %v344_v36  ;;  %v383_v40 = vsel %vm379_vm1, %v378_v19, %v375_v37 }
  0x7e   : > { %vm321_vm3 = vcmp.eq.s32.totalorder %v317_v14, 0  ;;  %vm325_vm4 = vcmp.eq.s32.totalorder %v317_v14, 15  ;;  %vm320_vm5 = vcmp.eq.s32.totalorder %v316_v20, 0  ;;  %vm324_vm6 = vcmp.eq.s32.totalorder %v316_v20, 15  ;;  %s1584_s9 = smov %s1583_s20  ;;  %s595_s29 = scalar_lea.hbm %s1583_s20, %s739_s4 }
  0x7f   : > { %v373_v25 = vsel %vm321_vm3, 0.0, %v347_v23  ;;  %v407_v27 = vsel %vm325_vm4, 0.0, %v380_v26  ;;  %v372_v31 = vsel %vm320_vm5, 0.0, %v348_v28  ;;  %v406_v32 = vsel %vm324_vm6, 0.0, %v381_v29  ;;  %s598_s6 = sshll.u32 %s595_s29, 4  ;;  %s980_s10 = scalar_lea.hbm %s1584_s9, 64  ;;  %s599_s6 = int_to_ptr.hbm [resolvable:$true] %s598_s6 }
  0x80   : > { %v1377_v30 = vsub.f32 %v373_v25, %v407_v27  ;;  %v1383_v35 = vsub.f32 %v372_v31, %v406_v32  ;;  %vm322_vm8 = vcmp.eq.s32.totalorder %v318_v24, 0  ;;  %vm326_vm9 = vcmp.eq.s32.totalorder %v318_v24, 15  ;;  %s974_s7 = sshra.s32 %s599_s6, 4  ;;  %s975_s7 = int_to_ptr.hbm [resolvable:$true] %s974_s7 }
  0x81   : > { %v349_v41 = vsel %vm345_vm0, %v344_v36, %v341_v21  ;;  %v382_v42 = vsel %vm379_vm1, %v375_v37, %v376_v22  ;;  %v374_v43 = vsel %vm322_vm8, 0.0, %v346_v39  ;;  %v396_v44 = vsel %vm334_vm7, %v868_v33, %v383_v40  ;;  %s976_s3 = scalar_lea.hbm %s975_s7, 32  ;;  %p981_p10 = scmp.lt.s32.totalorder %s975_s7, %s1584_s9 }
  0x82   : > { %496 = vrot.lane.b32.xlu1 %v1377_v30, %s1086_s1  ;;  %493 = vrot.lane.b32.xlu0 %v1383_v35, %s1086_s1  ;;  %v359_v45 = vsel %vm327_vm2, %v869_v34, %v349_v41  ;;  %v405_v46 = vsel %vm323_vm11, 0.0, %v382_v42  ;;  %v408_v47 = vsel %vm326_vm9, 0.0, %v396_v44  ;;  %v411_v54 = vadd.f32 %v302_v10, %v302_v10  ;;  %p977_p8 = scmp.ne.s32.totalorder %s975_s7, %s976_s3  ;;  %p982_p11 = scmp.lt.s32.totalorder %s980_s10, %s976_s3 }
  0x83   : > { %v371_v48 = vsel %vm319_vm10, 0.0, %v359_v45  ;;  %v1395_v49 = vsub.f32 %v374_v43, %v408_v47  ;;  %v416_v56 = vadd.f32 %v412_v50, %v374_v43  ;;  %v414_v57 = vadd.f32 %v410_v52, %v372_v31 }
  0x84   : > { %v413_v51 = vadd.f32 %v409_v38, %v371_v48  ;;  %v1397_v53 = vsub.f32 %v371_v48, %v405_v46  ;;  %v415_v58 = vadd.f32 %v411_v54, %v373_v25  ;;  %v336_v40 = vand.u32 127, %v304_v0  ;;  %p978_p1 = pnand %p977_p8, %p1259_p5  ;;  %p983_p0 = por %p982_p11, %p981_p10 }
  0x85   : > { %v420_v59 = vadd.f32 %v416_v56, %v408_v47  ;;  %v418_v60 = vadd.f32 %v414_v57, %v406_v32  ;;  %v555_v44 = vadd.f32 %v1383_v35, %v1383_v35  ;;  %vm578_vm15 = vcmask 130048  }
  0x86   : > { %v1399_v55 = vadd.f32 %v413_v51, %v405_v46  ;;  %v419_v61 = vadd.f32 %v415_v58, %v407_v27  ;;  %vm337_vm13 = vcmp.eq.s32.totalorder %v336_v40, 0  ;;  %vm338_vm14 = vcmp.eq.s32.totalorder %v336_v40, 15  ;;  %p979_p2 = pneg %p978_p1 }
  0x87   : > { %v554_v52 = vadd.f32 %v1397_v53, %v1397_v53  ;;  %v557_v58 = vadd.f32 %v1395_v49, %v1395_v49 }
  0x88   : > { %426 = vrot.lane.b32.xlu2 %v1399_v55, %s1086_s1  ;;  %p984_p7 = pnand %p983_p0, %p979_p2 }
  0x8a   : > { %499 = vrot.lane.b32.xlu1 %v1395_v49, %s1086_s1  ;;  %490 = vrot.lane.b32.xlu0 %v1397_v53, %s1086_s1 }
  0x90   : > { %429 = vrot.lane.b32.xlu2 %v418_v60, %s1086_s1 }
  0x92   : > { %435 = vrot.lane.b32.xlu1 %v420_v59, %s1086_s1  ;;  %432 = vrot.lane.b32.xlu0 %v419_v61, %s1086_s1 }
  0xe2   : > { %v427_v62 = vpop.permute.xlu2 %426 }
  0xe3   : > { %v428_v14 = vsel %vm425_vm12, %v427_v62, %v1399_v55 }
  0xea   : > { %v430_v4 = vpop.permute.xlu2 %429 }
  0xeb   : > { %v431_v5 = vsel %vm425_vm12, %v430_v4, %v418_v60 }
  0xf4   : > { %v497_v63 = vpop.permute.xlu1 %496  ;;  %v494_v1 = vpop.permute.xlu0 %493 }
  0xf5   : > { %v498_v2 = vsel %vm425_vm12, %v497_v63, %v1377_v30  ;;  %v495_v3 = vsel %vm425_vm12, %v494_v1, %v1383_v35 }
  0xf6   : > { %506 = vrot.lane.b32.xlu1 %v498_v2, %s1086_s1  ;;  %504 = vrot.lane.b32.xlu0 %v495_v3, %s1086_s1 }
  0xfc   : > { %v500_v6 = vpop.permute.xlu1 %499  ;;  %v491_v7 = vpop.permute.xlu0 %490 }
  0xfd   : > { %v492_v8 = vsel %vm425_vm12, %v491_v7, %v1397_v53  ;;  %v501_v11 = vsel %vm425_vm12, %v500_v6, %v1395_v49 }
  0xfe   : > { %440 = vrot.lane.b32.xlu1 %v431_v5, %s1086_s1  ;;  %502 = vrot.lane.b32.xlu2 %v492_v8, %s1086_s1 }
 0x104   : > { %v436_v9 = vpop.permute.xlu1 %435  ;;  %v433_v12 = vpop.permute.xlu0 %432 }
 0x105   : > { %v437_v10 = vsel %vm425_vm12, %v436_v9, %v420_v59  ;;  %v434_v13 = vsel %vm425_vm12, %v433_v12, %v419_v61 }
 0x106   : > { %444 = vrot.lane.b32.xlu0 %v437_v10, %s1086_s1  ;;  %508 = vrot.lane.b32.xlu2 %v501_v11, %s1086_s1  ;;  %v556_v11 = vadd.f32 %v1377_v30, %v1377_v30 }
 0x10e   : > { %438 = vrot.lane.b32.xlu0 %v428_v14, %s1086_s1  ;;  %442 = vrot.lane.b32.xlu2 %v434_v13, %s1086_s1 }
 0x158   : > { %v503_v15 = vpop.permute.xlu2 %502 }
 0x159   : > { %v510_v16 = vsel %vm425_vm12, %v503_v15, %v1397_v53 }
 0x15a   : > { %518 = vrot.lane.b32.xlu1 %v510_v16, %s1087_s23 }
 0x160   : > { %v509_v17 = vpop.permute.xlu2 %508 }
 0x161   : > { %v513_v18 = vsel %vm425_vm12, %v509_v17, %v1395_v49 }
 0x162   : > { %524 = vrot.lane.b32.xlu1 %v513_v18, %s1087_s23 }
 0x168   : > { %v507_v19 = vpop.permute.xlu1 %506  ;;  %v505_v21 = vpop.permute.xlu0 %504 }
 0x169   : > { %v512_v20 = vsel %vm425_vm12, %v507_v19, %v1377_v30  ;;  %v511_v22 = vsel %vm425_vm12, %v505_v21, %v1383_v35  ;;  %v443_v23 = vpop.permute.xlu2 %442 }
 0x16a   : > { %522 = vrot.lane.b32.xlu0 %v512_v20, %s1087_s23  ;;  %534 = vrot.lane.b32.xlu1 %v510_v16, %s1088_s25  ;;  %v448_v25 = vsel %vm425_vm12, %v443_v23, %v419_v61 }
 0x16b   : > { %520 = vrot.lane.b32.xlu2 %v511_v22, %s1087_s23 }
 0x170   : > { %v441_v24 = vpop.permute.xlu1 %440 }
 0x171   : > { %v447_v26 = vsel %vm425_vm12, %v441_v24, %v418_v60 }
 0x172   : > { %458 = vrot.lane.b32.xlu0 %v447_v26, %s1087_s23  ;;  %460 = vrot.lane.b32.xlu1 %v448_v25, %s1087_s23 }
 0x178   : > { %v445_v27 = vpop.permute.xlu0 %444 }
 0x179   : > { %v449_v28 = vsel %vm425_vm12, %v445_v27, %v420_v59 }
 0x17a   : > { %462 = vrot.lane.b32.xlu2 %v449_v28, %s1087_s23  ;;  %480 = vrot.lane.b32.xlu0 %v449_v28, %s1088_s25 }
 0x17b   : > { %476 = vrot.lane.b32.xlu1 %v447_v26, %s1088_s25 }
 0x180   : > { %v439_v29 = vpop.permute.xlu0 %438 }
 0x181   : > { %v446_v31 = vsel %vm425_vm12, %v439_v29, %v1399_v55 }
 0x182   : > { %474 = vrot.lane.b32.xlu0 %v446_v31, %s1088_s25  ;;  %478 = vrot.lane.b32.xlu2 %v448_v25, %s1088_s25 }
 0x183   : > { %540 = vrot.lane.b32.xlu1 %v513_v18, %s1088_s25 }
 0x18a   : > { %538 = vrot.lane.b32.xlu0 %v512_v20, %s1088_s25  ;;  %456 = vrot.lane.b32.xlu2 %v446_v31, %s1087_s23 }
 0x192   : > { %536 = vrot.lane.b32.xlu2 %v511_v22, %s1088_s25 }
 0x1c5   : > { %v521_v32 = vpop.permute.xlu2 %520 }
 0x1c6   : > { %v531_v45 = vsel %vm337_vm13, 0.0, %v521_v32 }
 0x1c7   : > { %v559_v46 = vadd.f32 %v555_v44, %v531_v45 }
 0x1cc   : > { %v519_v33 = vpop.permute.xlu1 %518 }
 0x1cd   : > { %v530_v56 = vsel %vm337_vm13, 0.0, %v519_v33 }
 0x1ce   : > { %v558_v61 = vadd.f32 %v554_v52, %v530_v56 }
 0x1d4   : > { %v463_v34 = vpop.permute.xlu2 %462  ;;  %v525_v36 = vpop.permute.xlu1 %524 }
 0x1d5   : > { %v533_v62 = vsel %vm337_vm13, 0.0, %v525_v36  ;;  %v471_v1 = vsel %vm337_vm13, 0.0, %v463_v34 }
 0x1d6   : > { %v561_v4 = vadd.f32 %v557_v58, %v533_v62 }
 0x1dc   : > { %v523_v37 = vpop.permute.xlu0 %522  ;;  %v479_v38 = vpop.permute.xlu2 %478 }
 0x1dd   : > { %v535_v39 = vpop.permute.xlu1 %534  ;;  %v532_v14 = vsel %vm337_vm13, 0.0, %v523_v37  ;;  %v488_v19 = vsel %vm338_vm14, 0.0, %v479_v38 }
 0x1de   : > { %v546_v59 = vsel %vm338_vm14, 0.0, %v535_v39  ;;  %v560_v20 = vadd.f32 %v556_v11, %v532_v14 }
 0x1df   : > { %v562_v2 = vadd.f32 %v558_v61, %v546_v59 }
 0x1e1   : > { %v570_v12 = vand.u32 2147483647, %v562_v2 }
 0x1e4   : > { %v459_v41 = vpop.permute.xlu0 %458  ;;  %v457_v42 = vpop.permute.xlu2 %456 }
 0x1e5   : > { %v461_v43 = vpop.permute.xlu1 %460  ;;  %v469_v0 = vsel %vm337_vm13, 0.0, %v459_v41  ;;  %v468_v5 = vsel %vm337_vm13, 0.0, %v457_v42 }
 0x1e6   : > { %v470_v15 = vsel %vm337_vm13, 0.0, %v461_v43 }
 0x1e7   : > { %v552_v21 = vsub.f32 %v488_v19, %v470_v15 }
 0x1e9   : > { %v568_v25 = vand.u32 2147483647, %v552_v21 }
 0x1ec   : > { %v481_v47 = vpop.permute.xlu0 %480  ;;  %v537_v48 = vpop.permute.xlu2 %536 }
 0x1ed   : > { %v477_v50 = vpop.permute.xlu1 %476  ;;  %v547_v51 = vsel %vm338_vm14, 0.0, %v537_v48  ;;  %v489_v53 = vsel %vm338_vm14, 0.0, %v481_v47 }
 0x1ee   : > { %v487_v54 = vsel %vm338_vm14, 0.0, %v477_v50  ;;  %v563_v55 = vadd.f32 %v559_v46, %v547_v51  ;;  %v553_v6 = vsub.f32 %v489_v53, %v471_v1 }
 0x1ef   : > { %v551_v35 = vsub.f32 %v487_v54, %v469_v0 }
 0x1f0   : > { %v571_v57 = vand.u32 2147483647, %v563_v55  ;;  %v569_v16 = vand.u32 2147483647, %v553_v6 }
 0x1f1   : > { %v567_v60 = vand.u32 2147483647, %v551_v35 }
 0x1f3   : > { %v575_v63 = vadd.f32 %v571_v57, %v567_v60 }
 0x1f4   : > { %v475_v3 = vpop.permute.xlu0 %474 }
 0x1f5   : > { %580 = vst.msk [vmem:[%s1471_s24 + $0x8] sm:$0xff] %vm578_vm15, %v575_v63  ;;  %v486_v49 = vsel %vm338_vm14, 0.0, %v475_v3  ;;  %v541_v7 = vpop.permute.xlu1 %540 }
 0x1f6   : > { %v550_v8 = vsub.f32 %v486_v49, %v468_v5  ;;  %v549_v9 = vsel %vm338_vm14, 0.0, %v541_v7 }
 0x1f7   : > { %v565_v10 = vadd.f32 %v561_v4, %v549_v9 }
 0x1f8   : > { %v566_v13 = vand.u32 2147483647, %v550_v8 }
 0x1f9   : > { %v573_v17 = vand.u32 2147483647, %v565_v10 }
 0x1fa   : > { %v574_v18 = vadd.f32 %v570_v12, %v566_v13 }
 0x1fb   : > { %v577_v30 = vadd.f32 %v573_v17, %v569_v16 }
 0x1fc   : > { %579 = vst.msk [vmem:[%s1471_s24] sm:$0xff] %vm578_vm15, %v574_v18  ;;  %v539_v22 = vpop.permute.xlu0 %538 }
 0x1fd   : > { %582 = vst.msk [vmem:[%s1471_s24 + $0x18] sm:$0xff] %vm578_vm15, %v577_v30  ;;  %v548_v23 = vsel %vm338_vm14, 0.0, %v539_v22 }
 0x1fe   : > { %v564_v24 = vadd.f32 %v560_v20, %v548_v23 }
 0x200   : > { %v572_v26 = vand.u32 2147483647, %v564_v24 }
 0x202   : > { %v576_v27 = vadd.f32 %v572_v26, %v568_v25 }
 0x204   : > { %581 = vst.msk [vmem:[%s1471_s24 + $0x10] sm:$0xff] %vm578_vm15, %v576_v27 }
 0x205   : > { %987 = shalt.err (!%p984_p7)
}
 0x206   : > { %s1089_s5 = smov 128   ;;  %s1090_s4 = smov 8  }
 0x207   : > { %763 = dma.vmem_to_hbm [thread:$0]  (%p1259_p5), %s597_s22, 512, %s599_s6, %s584_s8, %s1089_s5, %s1089_s5, %s1090_s4  }
 0x208 PF: > { %s1585_s1 = sld [smem:[#allocation18_spill]]  ;;  %s613_s23 = sand.u32 1, %s1070_s18  }
 0x209   : > { %p1587_p4 = scmp.ge.s32.totalorder %s1082_s21, 2  ;;  %s614_s25 = scalar_lea.sflag [#allocation4], %s613_s23 }
 0x20e   : > { %p1586_p3 = scmp.ne.s32.totalorder %s1585_s1, 0 }
 0x210   : > { %p776_p13 = pnand %p1587_p4, %p1586_p3 }
 0x212   : > { %p777_p6 = pneg %p776_p13 }
 0x214   : > { %1041 = dma.done.wait (%p777_p6), %s614_s25, 512  }
 0x215   : > { %1043 = vsyncadd (%p777_p6), %s614_s25, 4294966784  ;;  %s1588_s21 = sld [smem:[#allocation16_spill]]  ;;  %s1593_s12 = smov %s1050_s13 }
 0x216   : > { %s1589_s24 = sld [smem:[#allocation13_spill]]  ;;  %s1594_s13 = smov %s1054_s14 }
 0x217   : > { %s1590_s30 = sld [smem:[#allocation15_spill]]  ;;  %s1595_s14 = smov %s1311_s17 }
 0x218   : > { %s1591_s11 = sld [smem:[#allocation14_spill]]  ;;  %s1596_s15 = smov %s1062_s16 }
 0x219   : > { %s1592_s20 = sld [smem:[#allocation17_spill]]  ;;  %s1599_s18 = smov %s1074_s19 }
 0x21b   : > { %p19_p5 = scmp.ge.s32.totalorder %s1588_s21, 4  }
 0x21c   : > { %s1597_s16 = smov %s1589_s24 }
 0x21d   : > { %s1598_s17 = smov %s1590_s30  ;;  %21 = sbr.rel (!%p19_p5) target bundleno = 13 (0xd), region = 101 }
 0x21e   : > { %s1600_s19 = smov %s1591_s11 }
 0x222   :  { %620 = vsyncpa [#allocation3], 1 }
 0x223   :  { %622 = vsyncpa [#allocation3 + $0x1], 1 }
 0x224   :  { %623 = vsyncpa [#allocation6], 1 }
 0x225   :  { %625 = vsyncpa [#allocation6 + $0x1], 1 }
 0x226   :  { %626 = vsyncpa [#allocation4], 1 }
 0x227   :  { %628 = vsyncpa [#allocation4 + $0x1], 1 }

</bundles_post_ra>
